<compile_context>
chip_gen: v5e
topology: v5e:2x2
jax: 0.10.0
libtpu: 0.0.40
codegen_flags: <defaults>
</compile_context>

<pallas_src>
import functools

import jax
import jax.numpy as jnp
from jax.experimental import pallas as pl
from jax.experimental.pallas import tpu as pltpu

LANES = 128
SUBLANES = 8
ACC_BYTES = 4                        # kernel accumulates in f32
TILE_BYTES = 4 * 1024 * 1024         # per-input, per-step f32-equivalent tile budget
VMEM_LIMIT_BYTES = 48 * 1024 * 1024  # explicit: > v5e's 16 MiB default, < v7x's 64 MiB
SMALL_INPUT_BYTES = 2 * TILE_BYTES   # below this, skip the kernel (launch overhead dominates)


def _round_up(x: int, m: int) -> int:
    return (x + m - 1) // m * m


def _default_num_partials() -> int:
    # Only v7x has 2 TensorCores per chip; on single-TC parts (v5e/v6e) the
    # parallel split buys nothing and can DMA a wasted duplicate block.
    try:
        kind = jax.devices()[0].device_kind.lower()
    except Exception:
        return 1
    return 2 if ("v7" in kind or "7x" in kind) else 1


def _sumsq_kernel(pred_ref, tgt_ref, out_ref, *, rows, block_rows, steps,
                  num_blocks, acc_sublanes, exact_cover, has_partial_last):
    """Accumulate sum((pred-target)^2) into a resident (1, acc_sublanes, 128) block."""
    i = pl.program_id(1)  # reduction ("arbitrary") axis

    @pl.when(i == 0)
    def _():
        out_ref[...] = jnp.zeros_like(out_ref)

    # Cast to f32 inside the kernel: HBM traffic stays at native byte count.
    d = pred_ref[...].astype(jnp.float32) - tgt_ref[...].astype(jnp.float32)
    sq = d * d

    def accumulate(vals):
        # Vreg-shaped accumulation with acc_sublanes//8 independent add chains
        # (pure VPU adds; no per-step cross-lane reduce).
        out_ref[0] += vals.reshape(-1, acc_sublanes, LANES).sum(axis=0)

    if exact_cover:
        # Grid covers exactly the real rows: no masking anywhere.
        accumulate(sq)
    else:
        last_blk = num_blocks - 1
        blk = pl.program_id(0) * steps + i          # logical (unclamped) block index
        full_limit = last_blk if has_partial_last else num_blocks

        @pl.when(blk < full_limit)                  # fully valid block: unmasked path
        def _():
            accumulate(sq)

        if has_partial_last:
            @pl.when(blk == last_blk)               # partial last block: masked once
            def _():
                rows_left = rows - last_blk * block_rows   # static Python int
                row_ids = jax.lax.broadcasted_iota(
                    jnp.int32, (block_rows, LANES), 0)
                accumulate(jnp.where(row_ids < rows_left, sq, 0.0))
        # blk > last_blk: clamped duplicate block from the parallel split —
        # skip accumulation entirely (its DMA'd data is ignored).


@functools.partial(jax.jit,
                   static_argnames=("num_partials", "use_kernel", "tile_bytes"))
def rmse(pred: jax.Array, target: jax.Array, *, num_partials=None,
         use_kernel=None, tile_bytes: int = TILE_BYTES) -> jax.Array:
    """Root mean square error over all elements (matches torch.sqrt(MSELoss))."""
    assert pred.shape == target.shape, "pred/target must have identical shapes"
    n_elems = pred.size
    assert n_elems > 0
    dtype_bytes = max(jnp.dtype(pred.dtype).itemsize,
                      jnp.dtype(target.dtype).itemsize)

    if use_kernel is None:
        use_kernel = n_elems * dtype_bytes > SMALL_INPUT_BYTES
    if not use_kernel:
        # Tiny-input fast path: fixed kernel launch/grid overhead would dominate.
        d = pred.astype(jnp.float32) - target.astype(jnp.float32)
        return jnp.sqrt(jnp.mean(d * d))

    if num_partials is None:
        num_partials = _default_num_partials()

    p = pred.reshape(-1)
    t = target.reshape(-1)

    # dtype-aware sublane packing: (8,128) f32, (16,128) bf16, (32,128) 8-bit.
    packing = SUBLANES * max(1, ACC_BYTES // dtype_bytes)

    # Pad (zeros in BOTH tensors => zero contribution) so the lane-dense view
    # is a whole number of packed sublane groups.  At most packing*128 elems.
    pad = (-n_elems) % (LANES * packing)
    if pad:
        p = jnp.pad(p, (0, pad))
        t = jnp.pad(t, (0, pad))
    rows = (n_elems + pad) // LANES
    p2 = p.reshape(rows, LANES)
    t2 = t.reshape(rows, LANES)

    # Rows per grid step from a byte budget on the f32-equivalent footprint so
    # inputs (double-buffered) + in-kernel f32 intermediates stay inside VMEM.
    tile_rows = max(packing, tile_bytes // (LANES * max(dtype_bytes, ACC_BYTES)))
    tile_rows -= tile_rows % packing
    block_rows = min(tile_rows, _round_up(rows, packing))

    num_blocks = pl.cdiv(rows, block_rows)
    num_partials = max(1, min(num_partials, num_blocks))
    steps = pl.cdiv(num_blocks, num_partials)
    exact_cover = (num_partials * steps * block_rows == rows)
    has_partial_last = (rows % block_rows != 0)

    # Up to 4 independent accumulator chains for ILP (also improves f32 summation).
    acc_groups = next(g for g in (4, 2, 1) if block_rows % (SUBLANES * g) == 0)
    acc_sublanes = SUBLANES * acc_groups

    def in_map(c, i):
        # Clamp so no out-of-range block index is formed; a clamped duplicate
        # block is skipped inside the kernel (its logical index > last block).
        return (jnp.minimum(c * steps + i, num_blocks - 1), 0)

    kernel = functools.partial(
        _sumsq_kernel, rows=rows, block_rows=block_rows, steps=steps,
        num_blocks=num_blocks, acc_sublanes=acc_sublanes,
        exact_cover=exact_cover, has_partial_last=has_partial_last)

    partial_sums = pl.pallas_call(
        kernel,
        out_shape=jax.ShapeDtypeStruct((num_partials, acc_sublanes, LANES),
                                       jnp.float32),
        grid_spec=pltpu.PrefetchScalarGridSpec(
            num_scalar_prefetch=0,
            grid=(num_partials, steps),
            in_specs=[
                pl.BlockSpec((block_rows, LANES), in_map),
                pl.BlockSpec((block_rows, LANES), in_map),
            ],
            out_specs=pl.BlockSpec((1, acc_sublanes, LANES), lambda c, i: (c, 0, 0)),
        ),
        compiler_params=pltpu.CompilerParams(
            dimension_semantics=("parallel", "arbitrary"),
            vmem_limit_bytes=VMEM_LIMIT_BYTES,
        ),
    )(p2, t2)

    # Final cross-lane reduce + mean + sqrt in the wrapper (single fused XLA op).
    total = jnp.sum(partial_sums, dtype=jnp.float32)
    return jnp.sqrt(total / n_elems)


if __name__ == "__main__":
    key = jax.random.PRNGKey(0)
    k1, k2, k3, k4 = jax.random.split(key, 4)

    def ref_rmse(p, t):
        d = p.astype(jnp.float32) - t.astype(jnp.float32)
        return jnp.sqrt(jnp.mean(d * d))

    # 1) Small NCHW pred/target pair forced through the Pallas kernel.
    pred = jax.random.normal(k1, (2, 4, 16, 16), dtype=jnp.float32)
    target = jax.random.normal(k2, (2, 4, 16, 16), dtype=jnp.float32)
    out = rmse(pred, target, use_kernel=True)
    jax.block_until_ready(out)
    assert jnp.allclose(out, ref_rmse(pred, target), rtol=1e-5, atol=1e-6), out

    # 2) Default call (tiny input -> fast path) must agree too.
    out2 = rmse(pred, target)
    jax.block_until_ready(out2)
    assert jnp.allclose(out2, ref_rmse(pred, target), rtol=1e-5, atol=1e-6), out2

    # 3) Multi-step grid + partial last block + clamped duplicate block:
    #    small tile_bytes makes the tiny input span several grid steps.
    p3 = jax.random.normal(k3, (2, 4, 40, 60), dtype=jnp.float32)
    t3 = jax.random.normal(k4, (2, 4, 40, 60), dtype=jnp.float32)
    out3 = rmse(p3, t3, use_kernel=True, num_partials=2, tile_bytes=16 * 1024)
    jax.block_until_ready(out3)
    assert jnp.allclose(out3, ref_rmse(p3, t3), rtol=1e-5, atol=1e-6), out3

    # 4) bf16 inputs exercise the (16,128) sublane-packing path.
    p4 = p3[..., :32].astype(jnp.bfloat16)
    t4 = t3[..., :32].astype(jnp.bfloat16)
    out4 = rmse(p4, t4, use_kernel=True)
    jax.block_until_ready(out4)
    assert jnp.allclose(out4, ref_rmse(p4, t4), rtol=1e-3, atol=1e-4), out4

    print("KERNEL_OK")
</pallas_src>

<mosaic_0001>
module attributes {stable_mosaic.version = 11 : i64} {
  func.func @_sumsq_kernel(%arg0: i32, %arg1: i32, %arg2: memref<16x128xf32, #tpu.memory_space<vmem>>, %arg3: memref<16x128xf32, #tpu.memory_space<vmem>>, %arg4: memref<1x16x128xf32, #tpu.memory_space<vmem>>) attributes {dimension_semantics = [#tpu.dimension_semantics<parallel>, #tpu.dimension_semantics<arbitrary>], iteration_bounds = array<i64: 1, 1>, scalar_prefetch = 0 : i64, scratch_operands = 0 : i64, tpu.core_type = #tpu.core_type<tc>, window_params = [{transform_indices = @transform_0, window_bounds = array<i64: 16, 128>}, {transform_indices = @transform_1, window_bounds = array<i64: 16, 128>}, {transform_indices = @transform_2, window_bounds = array<i64: 1, 16, 128>}]} {
    %c0_i32 = arith.constant 0 : i32
    %0 = arith.cmpi eq, %arg1, %c0_i32 : i32
    %1 = arith.extui %0 : i1 to i32
    %c0_i32_0 = arith.constant 0 : i32
    %2 = arith.cmpi ne, %1, %c0_i32_0 : i32
    scf.if %2 {
      %cst_10 = arith.constant 0.000000e+00 : f32
      %15 = vector.broadcast %cst_10 : f32 to vector<1x16x128xf32>
      %c0_11 = arith.constant 0 : index
      %c0_12 = arith.constant 0 : index
      %c0_13 = arith.constant 0 : index
      %16 = vector.load %arg4[%c0_11, %c0_12, %c0_13] : memref<1x16x128xf32, #tpu.memory_space<vmem>>, vector<1x16x128xf32>
      tpu.vector_store %arg4[%c0_11, %c0_12, %c0_13], %15 {strides = array<i32>} : memref<1x16x128xf32, #tpu.memory_space<vmem>>, vector<1x16x128xf32>,
    } else {
    }
    %c0 = arith.constant 0 : index
    %c0_1 = arith.constant 0 : index
    %3 = vector.load %arg2[%c0, %c0_1] : memref<16x128xf32, #tpu.memory_space<vmem>>, vector<16x128xf32>
    %c0_2 = arith.constant 0 : index
    %c0_3 = arith.constant 0 : index
    %4 = vector.load %arg3[%c0_2, %c0_3] : memref<16x128xf32, #tpu.memory_space<vmem>>, vector<16x128xf32>
    %5 = arith.subf %3, %4 : vector<16x128xf32>
    %6 = arith.mulf %5, %5 : vector<16x128xf32>
    %c0_4 = arith.constant 0 : index
    %c0_5 = arith.constant 0 : index
    %c0_6 = arith.constant 0 : index
    %7 = vector.load %arg4[%c0_4, %c0_5, %c0_6] : memref<1x16x128xf32, #tpu.memory_space<vmem>>, vector<1x16x128xf32>
    %8 = vector.shape_cast %7 : vector<1x16x128xf32> to vector<16x128xf32>
    %9 = vector.shape_cast %6 : vector<16x128xf32> to vector<1x16x128xf32>
    %cst = arith.constant dense<0.000000e+00> : vector<16x128xf32>
    %10 = vector.multi_reduction <add>, %9, %cst [0] : vector<1x16x128xf32> to vector<16x128xf32>
    %11 = arith.addf %8, %10 : vector<16x128xf32>
    %c0_7 = arith.constant 0 : index
    %c0_8 = arith.constant 0 : index
    %c0_9 = arith.constant 0 : index
    %12 = vector.load %arg4[%c0_7, %c0_8, %c0_9] : memref<1x16x128xf32, #tpu.memory_space<vmem>>, vector<1x16x128xf32>
    %13 = vector.shape_cast %12 : vector<1x16x128xf32> to vector<16x128xf32>
    %14 = vector.shape_cast %11 : vector<16x128xf32> to vector<1x16x128xf32>
    tpu.vector_store %arg4[%c0_7, %c0_8, %c0_9], %14 {strides = array<i32>} : memref<1x16x128xf32, #tpu.memory_space<vmem>>, vector<1x16x128xf32>,
    return
  }
  func.func @transform_0(%arg0: i32, %arg1: i32) -> (i32, i32) {
    %c1_i32 = arith.constant 1 : i32
    %0 = arith.muli %arg0, %c1_i32 : i32
    %1 = arith.addi %0, %arg1 : i32
    %c0_i32 = arith.constant 0 : i32
    %2 = arith.minsi %1, %c0_i32 : i32
    %c0_i32_0 = arith.constant 0 : i32
    %c0_i32_1 = arith.constant 0 : i32
    return %2, %c0_i32_0 : i32, i32
  }
  func.func @transform_1(%arg0: i32, %arg1: i32) -> (i32, i32) {
    %c1_i32 = arith.constant 1 : i32
    %0 = arith.muli %arg0, %c1_i32 : i32
    %1 = arith.addi %0, %arg1 : i32
    %c0_i32 = arith.constant 0 : i32
    %2 = arith.minsi %1, %c0_i32 : i32
    %c0_i32_0 = arith.constant 0 : i32
    %c0_i32_1 = arith.constant 0 : i32
    return %2, %c0_i32_0 : i32, i32
  }
  func.func @transform_2(%arg0: i32, %arg1: i32) -> (i32, i32, i32) {
    %c0_i32 = arith.constant 0 : i32
    %c0_i32_0 = arith.constant 0 : i32
    %c0_i32_1 = arith.constant 0 : i32
    return %arg0, %c0_i32, %c0_i32_0 : i32, i32, i32
  }
}

</mosaic_0001>

<bundles_post_ra>
// kernel: rmse.1
= control target key start
LH: loop header
LB: loop body
LE: loop exit
PB: predicated region body
PF: predicated region fallthrough
CT: control target
= control target key end

     0   :  { %s147_s0 = inlined_call_operand.vmem [shape: f32[16,128], index: 0, kind: input, shape index: {}]   ;;  %s148_s1 = inlined_call_operand.vmem [shape: f32[16,128], index: 1, kind: input, shape index: {}]   ;;  %s149_s2 = inlined_call_operand.vmem [shape: f32[1,16,128], index: 2, kind: output, shape index: {}]  }
   0x1   :  { %v81_v0 = vld [vmem:[%s147_s0] sm:$0xff]  ;;  %v82_v2 = vld [vmem:[%s147_s0 + $0x8] sm:$0xff] }
   0x2   :  { %v83_v1 = vld [vmem:[%s148_s1] sm:$0xff]  ;;  %v84_v4 = vld [vmem:[%s148_s1 + $0x8] sm:$0xff] }
   0x3   :  { %v85_v3 = vsub.f32 %v81_v0, %v83_v1  ;;  %v86_v5 = vsub.f32 %v82_v2, %v84_v4 }
   0x5   :  { %v87_v6 = vmul.f32 %v85_v3, %v85_v3  ;;  %v88_v7 = vmul.f32 %v86_v5, %v86_v5 }
   0x7   :  { %95 = vst [vmem:[%s149_s2] sm:$0xff] %v87_v6 }
   0x8   :  { %96 = vst [vmem:[%s149_s2 + $0x8] sm:$0xff] %v88_v7 }

</bundles_post_ra>
